<compile_context>
chip_gen: v5e
topology: v5e:2x2
jax: 0.10.0
libtpu: 0.0.40
codegen_flags: <defaults>
</compile_context>

<pallas_src>
import functools
import math

import jax
import jax.numpy as jnp
from jax.experimental import pallas as pl
from jax.experimental.pallas import tpu as pltpu


# ----------------------------------------------------------------------------- kernels
def _bn_stats_kernel(x_ref, stats_ref, *, total, blk, tiles_per_shard):
    """Accumulate per-channel sum (row 0) / sum-of-squares (row 1) over the grid.

    Works for 2-D (rows, C) and 3-D (nb, C, L) input blocks; the ragged last tile
    (and any phantom tile of the last shard) is masked to zero contribution.
    """
    s = pl.program_id(0)          # shard (core) axis, "parallel"
    i = pl.program_id(1)          # row-tile axis, "arbitrary" (reduction)

    @pl.when(i == 0)
    def _():
        stats_ref[...] = jnp.zeros_like(stats_ref)

    tile = s * tiles_per_shard + i
    x = x_ref[...].astype(jnp.float32)
    valid = total - tile * blk                       # rows of this tile that are real
    idx0 = jax.lax.broadcasted_iota(jnp.int32, x.shape, 0)
    x = jnp.where(idx0 < valid, x, 0.0)

    axes = (0,) if x.ndim == 2 else (0, 2)           # 2-D: reduce rows; 3-D: reduce N and L
    s_sum = jnp.sum(x, axis=axes)
    sq_sum = jnp.sum(x * x, axis=axes)
    stats_ref[0:1, :] = stats_ref[0:1, :] + s_sum[None, :]
    stats_ref[1:2, :] = stats_ref[1:2, :] + sq_sum[None, :]


def _bn_apply_kernel(x_ref, scale_ref, shift_ref, o_ref):
    """y = x * scale + shift (scale/shift broadcast over the non-channel dims)."""
    o_ref[...] = (x_ref[...].astype(jnp.float32) * scale_ref[...]
                  + shift_ref[...]).astype(o_ref.dtype)


# ----------------------------------------------------------------------------- helpers
def _vmem_capacity_bytes():
    try:
        info = pltpu.get_tpu_info()
        cap = getattr(info, "vmem_capacity_bytes", None)
        if cap:
            return int(cap)
    except Exception:
        pass
    return 64 * 1024 * 1024      # conservative (v7x per-TC VMEM)


# ----------------------------------------------------------------------------- wrapper
def batch_norm_forward(x, gamma=None, beta=None,
                       running_mean=None, running_var=None,
                       *, eps=1e-5, momentum=0.1, training=True):
    """Forward of torch.nn.BatchNorm1d for (N, C) or (N, C, L) input.

    Returns (y, new_running_mean, new_running_var)."""
    if x.ndim not in (2, 3):
        raise ValueError("BatchNorm1d expects 2-D (N, C) or 3-D (N, C, L) input")

    orig_dtype = x.dtype
    C = x.shape[1]
    if gamma is None:
        gamma = jnp.ones((C,), jnp.float32)
    if beta is None:
        beta = jnp.zeros((C,), jnp.float32)

    cap = _vmem_capacity_bytes()
    # Target ~2-8 MiB per block, scaled to the chip's VMEM (v7x: 64 MiB -> ~6.4 MiB).
    block_bytes = max(512 * 1024, min(8 * 1024 * 1024, cap // 10))
    elem = x.dtype.itemsize

    if x.ndim == 2:
        R = x.shape[0]
        # Lane-pack small / non-128-multiple C into full-lane rows when possible.
        f = 1
        if C % 128 != 0:
            f_try = 128 // math.gcd(C, 128)
            if R % f_try == 0:
                f = f_try
        Rp, Cp = R // f, C * f
        xk = x.reshape(Rp, Cp)                                 # zero-cost (row-major)

        blk = min(Rp, max(8, block_bytes // max(1, Cp * elem)))
        if blk < Rp:
            blk = max(8, (blk // 8) * 8)
        row_bytes = Cp * elem
        count = float(R)
        total0 = Rp                                            # extent of blocked axis
        x_block = (blk, Cp)
        x_index = lambda i: (i, 0)
        ss_block = (1, Cp)
        expand_ss = lambda v: jnp.tile(v.reshape(1, C), (1, f))
        fold_stats = (lambda st: st.reshape(2, f, C).sum(axis=1)) if f > 1 else (lambda st: st)
        out_shape_k = (Rp, Cp)
    else:
        N, _, L = x.shape
        xk = x
        blk = min(N, max(1, block_bytes // max(1, C * L * elem)))
        row_bytes = C * L * elem
        count = float(N * L)
        total0 = N
        Cp = C
        x_block = (blk, C, L)
        x_index = lambda i: (i, 0, 0)
        ss_block = (1, C, 1)
        expand_ss = lambda v: v.reshape(1, C, 1)
        fold_stats = lambda st: st
        out_shape_k = (N, C, L)

    n_tiles = pl.cdiv(total0, blk)
    vmem_limit = int(min(cap, 4 * blk * row_bytes + (8 << 20)))

    use_batch_stats = training or running_mean is None or running_var is None
    if use_batch_stats:
        # Leading size-2 "parallel" axis -> stats reduction can split across the
        # two TensorCores on v7x; each shard owns its own (2, Cp) partial.
        S = 2 if n_tiles >= 2 else 1
        tps = pl.cdiv(n_tiles, S)
        last_tile = n_tiles - 1
        rank = len(x_block)

        def stats_x_index(si, ii, _tps=tps, _last=last_tile, _rank=rank):
            return (jnp.minimum(si * _tps + ii, _last),) + (0,) * (_rank - 1)

        partial = pl.pallas_call(
            functools.partial(_bn_stats_kernel, total=total0, blk=blk,
                              tiles_per_shard=tps),
            out_shape=jax.ShapeDtypeStruct((S, 2, Cp), jnp.float32),
            grid_spec=pltpu.PrefetchScalarGridSpec(
                num_scalar_prefetch=0,
                grid=(S, tps),
                in_specs=[pl.BlockSpec(x_block, stats_x_index)],
                out_specs=pl.BlockSpec((None, 2, Cp), lambda si, ii: (si, 0, 0)),
            ),
            compiler_params=pltpu.CompilerParams(
                dimension_semantics=("parallel", "arbitrary"),
                vmem_limit_bytes=vmem_limit),
        )(xk)
        stats = fold_stats(jnp.sum(partial, axis=0))           # (2, C)
        mean = stats[0] / jnp.float32(count)
        var = jnp.maximum(stats[1] / jnp.float32(count) - mean * mean, 0.0)
    else:
        mean = running_mean.astype(jnp.float32)
        var = running_var.astype(jnp.float32)

    inv_std = jax.lax.rsqrt(var + jnp.float32(eps))
    scale = gamma.astype(jnp.float32) * inv_std                # (C,)
    shift = beta.astype(jnp.float32) - mean * scale            # (C,)

    yk = pl.pallas_call(
        _bn_apply_kernel,
        out_shape=jax.ShapeDtypeStruct(out_shape_k, orig_dtype),
        grid_spec=pltpu.PrefetchScalarGridSpec(
            num_scalar_prefetch=0,
            grid=(n_tiles,),
            in_specs=[pl.BlockSpec(x_block, x_index),
                      pl.BlockSpec(ss_block, lambda i: (0,) * len(ss_block)),
                      pl.BlockSpec(ss_block, lambda i: (0,) * len(ss_block))],
            out_specs=pl.BlockSpec(x_block, x_index),
        ),
        compiler_params=pltpu.CompilerParams(
            dimension_semantics=("parallel",),
            vmem_limit_bytes=vmem_limit),
    )(xk, expand_ss(scale), expand_ss(shift))

    y = yk.reshape(x.shape) if x.ndim == 2 else yk

    # Running-stats update (PyTorch buffer side effect, done functionally).
    new_rm, new_rv = running_mean, running_var
    if training and running_mean is not None and running_var is not None:
        n = jnp.float32(count)
        unbiased_var = var * n / jnp.maximum(n - 1.0, 1.0)
        new_rm = (1.0 - momentum) * running_mean.astype(jnp.float32) + momentum * mean
        new_rv = (1.0 - momentum) * running_var.astype(jnp.float32) + momentum * unbiased_var

    return y, new_rm, new_rv


# ----------------------------------------------------------------------------- reference
def _reference_bn(x, gamma, beta, eps):
    """Pure-JAX mirror of torch.nn.BatchNorm1d training-mode forward."""
    if x.ndim == 2:
        axes = (0,)
        g = gamma.reshape(1, -1)
        b = beta.reshape(1, -1)
    else:
        axes = (0, 2)
        g = gamma.reshape(1, -1, 1)
        b = beta.reshape(1, -1, 1)
    mean = jnp.mean(x, axis=axes, keepdims=True)
    var = jnp.mean((x - mean) ** 2, axis=axes, keepdims=True)
    return (x - mean) / jnp.sqrt(var + eps) * g + b


# ----------------------------------------------------------------------------- demo / test
if __name__ == "__main__":
    key = jax.random.PRNGKey(0)
    k1, k2, k3, k4 = jax.random.split(key, 4)

    C = 32
    eps = 1e-5
    momentum = 0.1
    gamma = jax.random.uniform(k1, (C,), jnp.float32, 0.5, 1.5)
    beta = jax.random.uniform(k2, (C,), jnp.float32, -0.5, 0.5)
    running_mean = jnp.zeros((C,), jnp.float32)
    running_var = jnp.ones((C,), jnp.float32)

    # 2-D case: (batch, channels) -- exercises the lane-packed path (f=4 -> 128 lanes).
    x2d = jax.random.normal(k3, (64, C), jnp.float32)
    y2d, rm2, rv2 = batch_norm_forward(x2d, gamma, beta, running_mean, running_var,
                                       eps=eps, momentum=momentum, training=True)
    y2d = jax.block_until_ready(y2d)
    ref2d = _reference_bn(x2d, gamma, beta, eps)
    assert y2d.shape == x2d.shape
    assert jnp.allclose(y2d, ref2d, atol=1e-4, rtol=1e-4)

    # 3-D case: (batch, channels, length) -- exercises the native (nb, C, L) path.
    x3d = jax.random.normal(k4, (8, C, 16), jnp.float32)
    y3d, _, _ = batch_norm_forward(x3d, gamma, beta, running_mean, running_var,
                                   eps=eps, momentum=momentum, training=True)
    y3d = jax.block_until_ready(y3d)
    ref3d = _reference_bn(x3d, gamma, beta, eps)
    assert y3d.shape == x3d.shape
    assert jnp.allclose(y3d, ref3d, atol=1e-4, rtol=1e-4)

    # Running-stats update matches the standard PyTorch formulas.
    m_ref = jnp.mean(x2d, axis=0)
    v_ref = jnp.var(x2d, axis=0, ddof=1)
    assert jnp.allclose(rm2, (1 - momentum) * running_mean + momentum * m_ref, atol=1e-4)
    assert jnp.allclose(rv2, (1 - momentum) * running_var + momentum * v_ref, atol=1e-4)

    print("KERNEL_OK")
</pallas_src>

<mosaic_0001>
module attributes {stable_mosaic.version = 11 : i64} {
  func.func @_bn_stats_kernel(%arg0: i32, %arg1: i32, %arg2: memref<16x128xf32, #tpu.memory_space<vmem>>, %arg3: memref<1x2x128xf32, #tpu.memory_space<vmem>>) attributes {dimension_semantics = [#tpu.dimension_semantics<parallel>, #tpu.dimension_semantics<arbitrary>], iteration_bounds = array<i64: 1, 1>, scalar_prefetch = 0 : i64, scratch_operands = 0 : i64, tpu.core_type = #tpu.core_type<tc>, window_params = [{transform_indices = @transform_0, window_bounds = array<i64: 16, 128>}, {transform_indices = @transform_1, window_bounds = array<i64: 1, 2, 128>}]} {
    %c0_i32 = arith.constant 0 : i32
    %0 = arith.cmpi eq, %arg1, %c0_i32 : i32
    %1 = arith.extui %0 : i1 to i32
    %c0_i32_0 = arith.constant 0 : i32
    %2 = arith.cmpi ne, %1, %c0_i32_0 : i32
    scf.if %2 {
      %cst_16 = arith.constant 0.000000e+00 : f32
      %30 = vector.broadcast %cst_16 : f32 to vector<2x128xf32>
      %c0_17 = arith.constant 0 : index
      %c0_18 = arith.constant 0 : index
      %c0_19 = arith.constant 0 : index
      %31 = vector.load %arg3[%c0_17, %c0_18, %c0_19] : memref<1x2x128xf32, #tpu.memory_space<vmem>>, vector<1x2x128xf32>
      %32 = vector.shape_cast %31 : vector<1x2x128xf32> to vector<2x128xf32>
      %33 = vector.shape_cast %30 : vector<2x128xf32> to vector<1x2x128xf32>
      tpu.vector_store %arg3[%c0_17, %c0_18, %c0_19], %33 {strides = array<i32>} : memref<1x2x128xf32, #tpu.memory_space<vmem>>, vector<1x2x128xf32>,
    } else {
    }
    %c1_i32 = arith.constant 1 : i32
    %3 = arith.muli %arg0, %c1_i32 : i32
    %4 = arith.addi %3, %arg1 : i32
    %c0 = arith.constant 0 : index
    %c0_1 = arith.constant 0 : index
    %5 = vector.load %arg2[%c0, %c0_1] : memref<16x128xf32, #tpu.memory_space<vmem>>, vector<16x128xf32>
    %c16_i32 = arith.constant 16 : i32
    %6 = arith.muli %4, %c16_i32 : i32
    %c16_i32_2 = arith.constant 16 : i32
    %7 = arith.subi %c16_i32_2, %6 : i32
    %8 = tpu.iota {dimensions = array<i32: 0>} : vector<16x128xi32>
    %9 = vector.broadcast %7 : i32 to vector<16x128xi32>
    %10 = arith.cmpi slt, %8, %9 : vector<16x128xi32>
    %cst = arith.constant 0.000000e+00 : f32
    %11 = vector.broadcast %cst : f32 to vector<16x128xf32>
    %12 = arith.select %10, %5, %11 : vector<16x128xi1>, vector<16x128xf32>
    %cst_3 = arith.constant dense<0.000000e+00> : vector<128xf32>
    %13 = vector.multi_reduction <add>, %12, %cst_3 [0] : vector<16x128xf32> to vector<128xf32>
    %14 = arith.mulf %12, %12 : vector<16x128xf32>
    %cst_4 = arith.constant dense<0.000000e+00> : vector<128xf32>
    %15 = vector.multi_reduction <add>, %14, %cst_4 [0] : vector<16x128xf32> to vector<128xf32>
    %c0_5 = arith.constant 0 : index
    %c0_6 = arith.constant 0 : index
    %c0_7 = arith.constant 0 : index
    %16 = vector.load %arg3[%c0_5, %c0_6, %c0_7] : memref<1x2x128xf32, #tpu.memory_space<vmem>>, vector<1x1x128xf32>
    %17 = vector.shape_cast %16 : vector<1x1x128xf32> to vector<1x128xf32>
    %18 = vector.shape_cast %13 : vector<128xf32> to vector<1x128xf32>
    %19 = arith.addf %17, %18 : vector<1x128xf32>
    %c0_8 = arith.constant 0 : index
    %c0_9 = arith.constant 0 : index
    %c0_10 = arith.constant 0 : index
    %20 = vector.load %arg3[%c0_8, %c0_9, %c0_10] : memref<1x2x128xf32, #tpu.memory_space<vmem>>, vector<1x1x128xf32>
    %21 = vector.shape_cast %20 : vector<1x1x128xf32> to vector<1x128xf32>
    %22 = vector.shape_cast %19 : vector<1x128xf32> to vector<1x1x128xf32>
    tpu.vector_store %arg3[%c0_8, %c0_9, %c0_10], %22 {strides = array<i32>} : memref<1x2x128xf32, #tpu.memory_space<vmem>>, vector<1x1x128xf32>,
    %c0_11 = arith.constant 0 : index
    %c1 = arith.constant 1 : index
    %c0_12 = arith.constant 0 : index
    %23 = vector.load %arg3[%c0_11, %c1, %c0_12] : memref<1x2x128xf32, #tpu.memory_space<vmem>>, vector<1x1x128xf32>
    %24 = vector.shape_cast %23 : vector<1x1x128xf32> to vector<1x128xf32>
    %25 = vector.shape_cast %15 : vector<128xf32> to vector<1x128xf32>
    %26 = arith.addf %24, %25 : vector<1x128xf32>
    %c0_13 = arith.constant 0 : index
    %c1_14 = arith.constant 1 : index
    %c0_15 = arith.constant 0 : index
    %27 = vector.load %arg3[%c0_13, %c1_14, %c0_15] : memref<1x2x128xf32, #tpu.memory_space<vmem>>, vector<1x1x128xf32>
    %28 = vector.shape_cast %27 : vector<1x1x128xf32> to vector<1x128xf32>
    %29 = vector.shape_cast %26 : vector<1x128xf32> to vector<1x1x128xf32>
    tpu.vector_store %arg3[%c0_13, %c1_14, %c0_15], %29 {strides = array<i32>} : memref<1x2x128xf32, #tpu.memory_space<vmem>>, vector<1x1x128xf32>,
    return
  }
  func.func @transform_0(%arg0: i32, %arg1: i32) -> (i32, i32) {
    %c1_i32 = arith.constant 1 : i32
    %0 = arith.muli %arg0, %c1_i32 : i32
    %1 = arith.addi %0, %arg1 : i32
    %c0_i32 = arith.constant 0 : i32
    %2 = arith.minsi %1, %c0_i32 : i32
    %c0_i32_0 = arith.constant 0 : i32
    %c0_i32_1 = arith.constant 0 : i32
    return %2, %c0_i32_0 : i32, i32
  }
  func.func @transform_1(%arg0: i32, %arg1: i32) -> (i32, i32, i32) {
    %c0_i32 = arith.constant 0 : i32
    %c0_i32_0 = arith.constant 0 : i32
    %c0_i32_1 = arith.constant 0 : i32
    return %arg0, %c0_i32, %c0_i32_0 : i32, i32, i32
  }
}

</mosaic_0001>

<bundles_post_ra>
// kernel: tpu_custom_call.1
= control target key start
LH: loop header
LB: loop body
LE: loop exit
PB: predicated region body
PF: predicated region fallthrough
CT: control target
= control target key end

     0   :  { %6 = vsyncpa [#allocation3], 0  ;;  %s172_s0 = inlined_call_operand.hbm [shape: f32[16,128], index: 0, kind: input, shape index: {}]   ;;  %s173_s1 = inlined_call_operand.hbm [shape: f32[1,2,128], index: 1, kind: output, shape index: {}]  }
   0x1   :  { %7 = vsyncpa [#allocation4], 0  ;;  %s18_s8 = sshll.u32 %s172_s0, 4  ;;  %s151_s9 = smov [#allocation2]   ;;  %s19_s8 = int_to_ptr.hbm [resolvable:$true] %s18_s8 }
   0x2   :  { %s20_s10 = sshll.u32 %s151_s9, 4  ;;  %s152_s11 = smov 128   ;;  %s21_s10 = int_to_ptr.vmem [resolvable:$true] %s20_s10 }
   0x3   :  { %s153_s12 = smov 8  }
   0x4   :  { %26 = dma.hbm_to_vmem [thread:$0]  %s19_s8, 256, %s21_s10, [#allocation3], %s152_s11, %s152_s11, %s153_s12  }
   0x5   :  { %147 = dma.done.wait [#allocation3], 256  }
   0x6   :  { %148 = vsyncadd [#allocation3], 4294967040  ;;  %v154_v0 = vmov 0.0   ;;  %v41_v1 = vld [vmem:[#allocation2] sm:$0xff]  ;;  %v42_v2 = vld [vmem:[#allocation2 + $0x8] sm:$0xff]  ;;  %s155_s0 = smov [#allocation5]  }
   0x7   :  { %39 = vst [vmem:[#allocation5] sm:$0x3] %v154_v0  ;;  %v53_v3 = vadd.f32 %v42_v2, %v41_v1  ;;  %v60_v4 = vmul.f32 %v41_v1, %v41_v1  ;;  %v61_v5 = vmul.f32 %v42_v2, %v42_v2  ;;  %s80_s13 = sshll.u32 %s155_s0, 4  ;;  %s82_s16 = sshll.u32 %s173_s1, 4  ;;  %s81_s13 = int_to_ptr.vmem [resolvable:$true] %s80_s13  ;;  %s83_s16 = int_to_ptr.hbm [resolvable:$true] %s82_s16 }
   0x9   :  { %v54_v6 = vrot.slane %v53_v3, 4  ;;  %v62_v7 = vadd.f32 %v61_v5, %v60_v4 }
   0xb   :  { %v55_v8 = vadd.f32 %v54_v6, %v53_v3  ;;  %v63_v9 = vrot.slane %v62_v7, 4 }
   0xd   :  { %v56_v10 = vrot.slane %v55_v8, 2  ;;  %v64_v11 = vadd.f32 %v63_v9, %v62_v7 }
   0xe   :  { %v69_v16 = vld [vmem:[#allocation5] sm:$0x1]  ;;  %v72_v19 = vld [vmem:[#allocation5 + $0x1] sm:$0x1] }
   0xf   :  { %v57_v12 = vadd.f32 %v56_v10, %v55_v8  ;;  %v65_v13 = vrot.slane %v64_v11, 2 }
  0x11   :  { %v58_v14 = vrot.slane %v57_v12, 1  ;;  %v66_v15 = vadd.f32 %v65_v13, %v64_v11 }
  0x13   :  { %v59_v17 = vadd.f32 %v58_v14, %v57_v12  ;;  %v67_v18 = vrot.slane %v66_v15, 1 }
  0x15   :  { %v70_v20 = vadd.f32 %v69_v16, %v59_v17  ;;  %v68_v21 = vadd.f32 %v67_v18, %v66_v15 }
  0x17   :  { %71 = vst [vmem:[#allocation5] sm:$0x1] %v70_v20  ;;  %v73_v22 = vadd.f32 %v72_v19, %v68_v21 }
  0x19   :  { %74 = vst [vmem:[#allocation5 + $0x1] sm:$0x1] %v73_v22 }
  0x1a   :  { %85 = dma.vmem_to_hbm [thread:$0]  %s81_s13, 32, %s83_s16, [#allocation4]  }
  0x1b   :  { %149 = dma.done.wait [#allocation4], 32  }
  0x1c   :  { %150 = vsyncadd [#allocation4], 4294967264 }
  0x1d   :  { %90 = vsyncpa [#allocation3], 1 }
  0x1e   :  { %91 = vsyncpa [#allocation4], 1 }

</bundles_post_ra>
